<compile_context>
chip_gen: v5e
topology: v5e:2x2
jax: 0.10.0
libtpu: 0.0.40
codegen_flags: <defaults>
</compile_context>

<pallas_src>
import jax
import jax.numpy as jnp
from jax.experimental import pallas as pl
from jax.experimental.pallas import tpu as pltpu


def _round_up(n, m):
    return ((n + m - 1) // m) * m


def _nn_policy_kernel(x_ref, w1t_ref, b1t_ref, w2d_ref, b2d_ref, out_ref):
    # x_ref:   (obs, TB)   feature-major, batch on lanes
    # w1t_ref: (H, obs)
    # b1t_ref: (H, 1)
    # w2d_ref: (1, H)      = w2[:,0] - w2[:,1]
    # b2d_ref: (1, 1)      = b2[0]   - b2[1]
    # out_ref: (2, TB)
    x = x_ref[...]
    w1t = w1t_ref[...]
    obs = x_ref.shape[0]

    # ---- Layer 1 on the VPU: K=obs(=4) unrolled broadcast-FMAs ----
    h = w1t[:, 0:1] * x[0:1, :]                       # (H, TB)
    for k in range(1, obs):                           # static unroll, obs is tiny
        h = h + w1t[:, k:k + 1] * x[k:k + 1, :]
    h = jnp.maximum(h + b1t_ref[...], 0.0)            # (H, TB)

    # ---- Layer 2 + softmax as a single logit difference ----
    d = jnp.dot(w2d_ref[...], h, preferred_element_type=jnp.float32)  # (1, TB) on MXU
    d = d + b2d_ref[...]                               # broadcast (1,1) -> (1,TB)

    e = jnp.exp(d)                                     # EUP
    p1 = pl.reciprocal(1.0 + e, approx=False)          # exact; exp->inf gives p1=0
    p0 = 1.0 - p1

    probs = jnp.concatenate([p0, p1], axis=0)          # (2, TB), single lane-dense store
    out_ref[...] = probs.astype(out_ref.dtype)


def nn_policy_forward_feature_major(x_t, w1, b1, w2, b2, *, block_b=8192):
    """Core path. x_t: (4, B) feature-major float32 -> probs_t: (2, B) float32."""
    obs_dim, B = x_t.shape
    H = w1.shape[1]
    A = w2.shape[1]
    assert A == 2, "logit-difference softmax specialization assumes 2 actions"

    # Tiny host-side weight prep (negligible vs. the data path).
    w1t = w1.T                                  # (H, obs)
    b1t = jnp.reshape(b1, (H, 1))               # (H, 1)
    w2t = w2.T                                  # (2, H)
    w2d = w2t[0:1, :] - w2t[1:2, :]             # (1, H)
    b2v = jnp.reshape(b2, (A,))
    b2d = jnp.reshape(b2v[0] - b2v[1], (1, 1))  # (1, 1)

    # Batch tile: large (amortize per-step overhead), 128-aligned, but clamped to
    # ~ceil(B/2) so large batches always give >=2 tiles (feeds both v7x TCs).
    # Keep block_b <= ~8-16K so the (H, TB) h temporary stays within v7x VMEM.
    half = _round_up(pl.cdiv(B, 2), 128)
    tb = max(128, min(_round_up(block_b, 128), half))
    grid_b = pl.cdiv(B, tb)
    b_pad = grid_b * tb

    # Only the degenerate "block wider than the whole array" case gets a tiny pad
    # (B < 128); otherwise the ragged last block uses Pallas last-block padding.
    if tb > B:
        x_t = jnp.pad(x_t, ((0, 0), (0, tb - B)))

    out_t = pl.pallas_call(
        _nn_policy_kernel,
        out_shape=jax.ShapeDtypeStruct((A, b_pad), jnp.float32),
        grid_spec=pltpu.PrefetchScalarGridSpec(
            num_scalar_prefetch=0,
            grid=(grid_b,),
            in_specs=[
                pl.BlockSpec((obs_dim, tb), lambda i: (0, i)),   # x tile, pipelined
                pl.BlockSpec((H, obs_dim), lambda i: (0, 0)),    # W1^T, VMEM-resident
                pl.BlockSpec((H, 1), lambda i: (0, 0)),          # b1,   VMEM-resident
                pl.BlockSpec((1, H), lambda i: (0, 0)),          # w2 diff, resident
                pl.BlockSpec((1, 1), lambda i: (0, 0)),          # b2 diff, resident
            ],
            out_specs=pl.BlockSpec((A, tb), lambda i: (0, i)),   # lane-dense output
        ),
        compiler_params=pltpu.CompilerParams(
            dimension_semantics=("parallel",),   # shards batch tiles across TCs on v7x
        ),
    )(x_t, w1t, b1t, w2d, b2d)

    return out_t[:, :B]   # drop padded columns (writes beyond B were in-bounds scratch)


def nn_policy_forward(x, w1, b1, w2, b2, *, block_b=8192):
    """Module-convention wrapper. x: (B, 4) float32 -> probs: (B, 2) float32."""
    probs_t = nn_policy_forward_feature_major(x.T, w1, b1, w2, b2, block_b=block_b)
    return probs_t.T


def init_params(key, num_hidden=128, obs_dim=4, act_dim=2):
    """Deterministic init matching nn.Linear's uniform(-1/sqrt(fan_in), 1/sqrt(fan_in))."""
    k1, k2, k3, k4 = jax.random.split(key, 4)
    bound1 = 1.0 / jnp.sqrt(obs_dim)
    bound2 = 1.0 / jnp.sqrt(num_hidden)
    w1 = jax.random.uniform(k1, (obs_dim, num_hidden), jnp.float32, -bound1, bound1)
    b1 = jax.random.uniform(k2, (1, num_hidden), jnp.float32, -bound1, bound1)
    w2 = jax.random.uniform(k3, (num_hidden, act_dim), jnp.float32, -bound2, bound2)
    b2 = jax.random.uniform(k4, (1, act_dim), jnp.float32, -bound2, bound2)
    return w1, b1, w2, b2


def _reference(x, w1, b1, w2, b2):
    hp = jax.lax.Precision.HIGHEST   # keep the reference in true f32 on the MXU
    h = jnp.maximum(jnp.dot(x, w1, precision=hp) + b1, 0.0)
    return jax.nn.softmax(jnp.dot(h, w2, precision=hp) + b2, axis=-1)


if __name__ == "__main__":
    key = jax.random.PRNGKey(0)
    k_param, k_x1, k_x2 = jax.random.split(key, 3)

    OBS, H, A = 4, 128, 2
    w1, b1, w2, b2 = init_params(k_param, num_hidden=H, obs_dim=OBS, act_dim=A)

    # Small deployment-like batch (single grid step, tiny tail pad).
    B1 = 8
    x1 = jax.random.normal(k_x1, (B1, OBS), jnp.float32)
    probs1 = jax.block_until_ready(nn_policy_forward(x1, w1, b1, w2, b2))
    ref1 = _reference(x1, w1, b1, w2, b2)
    assert probs1.shape == (B1, A)
    assert jnp.allclose(probs1, ref1, atol=1e-4, rtol=1e-4)
    assert jnp.allclose(jnp.sum(probs1, axis=-1), 1.0, atol=1e-5)

    # Larger ragged batch: exercises 2-tile grid + Pallas last-block padding.
    B2 = 300
    x2 = jax.random.normal(k_x2, (B2, OBS), jnp.float32)
    probs2 = jax.block_until_ready(nn_policy_forward(x2, w1, b1, w2, b2))
    ref2 = _reference(x2, w1, b1, w2, b2)
    assert probs2.shape == (B2, A)
    assert jnp.allclose(probs2, ref2, atol=1e-4, rtol=1e-4)
    assert jnp.allclose(jnp.sum(probs2, axis=-1), 1.0, atol=1e-5)
    assert bool(jnp.all(probs2 >= 0.0)) and bool(jnp.all(probs2 <= 1.0))

    # TODO(synk): get_probs (gather) and sample_action (multinomial) are host-side
    # utilities; they stay in plain JAX rather than being faked as kernels.
    print("KERNEL_OK")
</pallas_src>

<mosaic_0001>
module attributes {stable_mosaic.version = 11 : i64} {
  func.func @_nn_policy_kernel(%arg0: i32, %arg1: memref<4x128xf32, #tpu.memory_space<vmem>>, %arg2: memref<128x4xf32, #tpu.memory_space<vmem>>, %arg3: memref<128x1xf32, #tpu.memory_space<vmem>>, %arg4: memref<1x128xf32, #tpu.memory_space<vmem>>, %arg5: memref<1x1xf32, #tpu.memory_space<vmem>>, %arg6: memref<2x128xf32, #tpu.memory_space<vmem>>) attributes {dimension_semantics = [#tpu.dimension_semantics<parallel>], iteration_bounds = array<i64: 1>, scalar_prefetch = 0 : i64, scratch_operands = 0 : i64, tpu.core_type = #tpu.core_type<tc>, window_params = [{transform_indices = @transform_0, window_bounds = array<i64: 4, 128>}, {pipeline_mode = #tpu.pipeline_mode<synchronous>, transform_indices = @transform_1, window_bounds = array<i64: 128, 4>}, {pipeline_mode = #tpu.pipeline_mode<synchronous>, transform_indices = @transform_2, window_bounds = array<i64: 128, 1>}, {pipeline_mode = #tpu.pipeline_mode<synchronous>, transform_indices = @transform_3, window_bounds = array<i64: 1, 128>}, {pipeline_mode = #tpu.pipeline_mode<synchronous>, transform_indices = @transform_4, window_bounds = array<i64: 1, 1>}, {transform_indices = @transform_5, window_bounds = array<i64: 2, 128>}]} {
    %c0 = arith.constant 0 : index
    %c0_0 = arith.constant 0 : index
    %0 = vector.load %arg1[%c0, %c0_0] : memref<4x128xf32, #tpu.memory_space<vmem>>, vector<4x128xf32>
    %c0_1 = arith.constant 0 : index
    %c0_2 = arith.constant 0 : index
    %1 = vector.load %arg2[%c0_1, %c0_2] : memref<128x4xf32, #tpu.memory_space<vmem>>, vector<128x4xf32>
    %2 = vector.extract_strided_slice %1 {offsets = [0, 0], sizes = [128, 1], strides = [1, 1]} : vector<128x4xf32> to vector<128x1xf32>
    %3 = vector.extract_strided_slice %0 {offsets = [0, 0], sizes = [1, 128], strides = [1, 1]} : vector<4x128xf32> to vector<1x128xf32>
    %4 = vector.broadcast %2 : vector<128x1xf32> to vector<128x128xf32>
    %5 = vector.broadcast %3 : vector<1x128xf32> to vector<128x128xf32>
    %6 = arith.mulf %4, %5 : vector<128x128xf32>
    %7 = vector.extract_strided_slice %1 {offsets = [0, 1], sizes = [128, 1], strides = [1, 1]} : vector<128x4xf32> to vector<128x1xf32>
    %8 = vector.extract_strided_slice %0 {offsets = [1, 0], sizes = [1, 128], strides = [1, 1]} : vector<4x128xf32> to vector<1x128xf32>
    %9 = vector.broadcast %7 : vector<128x1xf32> to vector<128x128xf32>
    %10 = vector.broadcast %8 : vector<1x128xf32> to vector<128x128xf32>
    %11 = arith.mulf %9, %10 : vector<128x128xf32>
    %12 = arith.addf %6, %11 : vector<128x128xf32>
    %13 = vector.extract_strided_slice %1 {offsets = [0, 2], sizes = [128, 1], strides = [1, 1]} : vector<128x4xf32> to vector<128x1xf32>
    %14 = vector.extract_strided_slice %0 {offsets = [2, 0], sizes = [1, 128], strides = [1, 1]} : vector<4x128xf32> to vector<1x128xf32>
    %15 = vector.broadcast %13 : vector<128x1xf32> to vector<128x128xf32>
    %16 = vector.broadcast %14 : vector<1x128xf32> to vector<128x128xf32>
    %17 = arith.mulf %15, %16 : vector<128x128xf32>
    %18 = arith.addf %12, %17 : vector<128x128xf32>
    %19 = vector.extract_strided_slice %1 {offsets = [0, 3], sizes = [128, 1], strides = [1, 1]} : vector<128x4xf32> to vector<128x1xf32>
    %20 = vector.extract_strided_slice %0 {offsets = [3, 0], sizes = [1, 128], strides = [1, 1]} : vector<4x128xf32> to vector<1x128xf32>
    %21 = vector.broadcast %19 : vector<128x1xf32> to vector<128x128xf32>
    %22 = vector.broadcast %20 : vector<1x128xf32> to vector<128x128xf32>
    %23 = arith.mulf %21, %22 : vector<128x128xf32>
    %24 = arith.addf %18, %23 : vector<128x128xf32>
    %c0_3 = arith.constant 0 : index
    %c0_4 = arith.constant 0 : index
    %25 = vector.load %arg3[%c0_3, %c0_4] : memref<128x1xf32, #tpu.memory_space<vmem>>, vector<128x1xf32>
    %26 = vector.broadcast %25 : vector<128x1xf32> to vector<128x128xf32>
    %27 = arith.addf %24, %26 : vector<128x128xf32>
    %cst = arith.constant 0.000000e+00 : f32
    %28 = vector.broadcast %cst : f32 to vector<128x128xf32>
    %29 = arith.maximumf %27, %28 : vector<128x128xf32>
    %c0_5 = arith.constant 0 : index
    %c0_6 = arith.constant 0 : index
    %30 = vector.load %arg4[%c0_5, %c0_6] : memref<1x128xf32, #tpu.memory_space<vmem>>, vector<1x128xf32>
    %cst_7 = arith.constant dense<0.000000e+00> : vector<1x128xf32>
    %31 = tpu.matmul %30, %29, %cst_7 {dimension_numbers = #tpu.dot_dimension_numbers<[1], [0], [0], [1], [0, 0, 1, 1], [], []>} : vector<1x128xf32>, vector<128x128xf32>, vector<1x128xf32> -> vector<1x128xf32>
    %c0_8 = arith.constant 0 : index
    %c0_9 = arith.constant 0 : index
    %32 = vector.load %arg5[%c0_8, %c0_9] : memref<1x1xf32, #tpu.memory_space<vmem>>, vector<1x1xf32>
    %33 = vector.broadcast %32 : vector<1x1xf32> to vector<1x128xf32>
    %34 = arith.addf %31, %33 : vector<1x128xf32>
    %35 = math.exp %34 : vector<1x128xf32>
    %cst_10 = arith.constant 1.000000e+00 : f32
    %36 = vector.broadcast %cst_10 : f32 to vector<1x128xf32>
    %37 = arith.addf %36, %35 : vector<1x128xf32>
    %38 = tpu.reciprocal %37 : vector<1x128xf32> -> vector<1x128xf32>
    %cst_11 = arith.constant 1.000000e+00 : f32
    %39 = vector.broadcast %cst_11 : f32 to vector<1x128xf32>
    %40 = arith.subf %39, %38 : vector<1x128xf32>
    %41 = tpu.concatenate %40, %38 in 0 : vector<1x128xf32>, vector<1x128xf32> -> vector<2x128xf32>
    %c0_12 = arith.constant 0 : index
    %c0_13 = arith.constant 0 : index
    %42 = vector.load %arg6[%c0_12, %c0_13] : memref<2x128xf32, #tpu.memory_space<vmem>>, vector<2x128xf32>
    tpu.vector_store %arg6[%c0_12, %c0_13], %41 {strides = array<i32>} : memref<2x128xf32, #tpu.memory_space<vmem>>, vector<2x128xf32>,
    return
  }
  func.func @transform_0(%arg0: i32) -> (i32, i32) {
    %c0_i32 = arith.constant 0 : i32
    %c0_i32_0 = arith.constant 0 : i32
    return %c0_i32, %arg0 : i32, i32
  }
  func.func @transform_1(%arg0: i32) -> (i32, i32) {
    %c0_i32 = arith.constant 0 : i32
    %c0_i32_0 = arith.constant 0 : i32
    %c0_i32_1 = arith.constant 0 : i32
    return %c0_i32, %c0_i32_0 : i32, i32
  }
  func.func @transform_2(%arg0: i32) -> (i32, i32) {
    %c0_i32 = arith.constant 0 : i32
    %c0_i32_0 = arith.constant 0 : i32
    %c0_i32_1 = arith.constant 0 : i32
    return %c0_i32, %c0_i32_0 : i32, i32
  }
  func.func @transform_3(%arg0: i32) -> (i32, i32) {
    %c0_i32 = arith.constant 0 : i32
    %c0_i32_0 = arith.constant 0 : i32
    %c0_i32_1 = arith.constant 0 : i32
    return %c0_i32, %c0_i32_0 : i32, i32
  }
  func.func @transform_4(%arg0: i32) -> (i32, i32) {
    %c0_i32 = arith.constant 0 : i32
    %c0_i32_0 = arith.constant 0 : i32
    %c0_i32_1 = arith.constant 0 : i32
    return %c0_i32, %c0_i32_0 : i32, i32
  }
  func.func @transform_5(%arg0: i32) -> (i32, i32) {
    %c0_i32 = arith.constant 0 : i32
    %c0_i32_0 = arith.constant 0 : i32
    return %c0_i32, %arg0 : i32, i32
  }
}

</mosaic_0001>

<bundles_post_ra>
// kernel: tpu_custom_call.1
= control target key start
LH: loop header
LB: loop body
LE: loop exit
PB: predicated region body
PF: predicated region fallthrough
CT: control target
= control target key end

     0   :  { %s1112_s0 = inlined_call_operand.vmem [shape: f32[4,128], index: 0, kind: input, shape index: {}]   ;;  %s1113_s1 = inlined_call_operand.vmem [shape: f32[128,4], index: 1, kind: input, shape index: {}]   ;;  %s1114_s2 = inlined_call_operand.vmem [shape: f32[128,1], index: 2, kind: input, shape index: {}]   ;;  %s1115_s3 = inlined_call_operand.vmem [shape: f32[1,128], index: 3, kind: input, shape index: {}]   ;;  %s1116_s4 = inlined_call_operand.<no memory space> [shape: f32[1,1], index: 4, kind: input, shape index: {}]   ;;  %s1117_s5 = inlined_call_operand.hbm [shape: f32[2,128], index: 5, kind: output, shape index: {}]  }
   0x1   :  { %v10_v0 = vstv %s1116_s4 }
   0x2   :  { %11 = vst [vmem:[#allocation2] sm:$0x1] %v10_v0 }
   0x3   :  { %v726_v1 = vld [vmem:[%s1113_s1 + $0x20] sm:$0xff]  ;;  %v731_v2 = vld [vmem:[%s1113_s1 + $0x10] sm:$0xff]  ;;  %v685_v3 = vmov 1   ;;  %v686_v4 = vmov 0  }
   0x4   :  { %633 = vset.pattern.permute.xlu0 %v685_v3  ;;  %630 = vset.pattern.permute.xlu2 %v686_v4 }
   0x5   :  { %629 = vset.pattern.permute.xlu1 %v686_v4  ;;  %62 = vperm.xlu2 %630, %v726_v1  }
   0x6   :  { %146 = vperm.xlu0 %633, %v731_v2   ;;  %52 = vperm.xlu1 %629, %v731_v2  }
   0x7   :  { %12 = vsyncpa [#allocation4], 0  ;;  %v29_v5 = vld [vmem:[%s1113_s1 + $0x28] sm:$0xff]  ;;  %v744_v6 = vld [vmem:[%s1113_s1 + $0x38] sm:$0xff]  ;;  %v687_v14 = vmov 2   ;;  %v688_v18 = vmov 3  }
   0x8   :  { %v749_v7 = vld [vmem:[%s1113_s1 + $0x18] sm:$0xff]  ;;  %v756_v8 = vld [vmem:[%s1113_s1 + $0x40] sm:$0xff]  ;;  %v761_v9 = vld [vmem:[%s1113_s1 + $0x50] sm:$0xff]  ;;  %s615_s8 = sshll.u32 %s1117_s5, 4  ;;  %vm605_vm4 = vcmask 1040384   ;;  %s616_s8 = int_to_ptr.hbm [resolvable:$true] %s615_s8 }
   0x9   :  { %v769_v10 = vld [vmem:[%s1113_s1 + $0x58] sm:$0xff]  ;;  %v774_v11 = vld [vmem:[%s1113_s1 + $0x68] sm:$0xff]  ;;  %v782_v12 = vld [vmem:[%s1113_s1 + $0x70] sm:$0xff] }
   0xa   :  { %v787_v13 = vld [vmem:[%s1113_s1] sm:$0xff]  ;;  %v796_v15 = vld [vmem:[%s1113_s1 + $0x8] sm:$0xff]  ;;  %v806_v16 = vld [vmem:[%s1113_s1 + $0x30] sm:$0xff] }
   0xb   :  { %v39_v17 = vld [vmem:[%s1113_s1 + $0x78] sm:$0xff]  ;;  %v816_v19 = vld [vmem:[%s1113_s1 + $0x48] sm:$0xff]  ;;  %v36_v20 = vld [vmem:[%s1113_s1 + $0x60] sm:$0xff] }
   0xc   :  { %v846_v24 = vld [vmem:[%s1112_s0] sm:$0xf]  ;;  %v443_v42 = vld [vmem:[%s1114_s2 + $0x78] sm:$0xff]  ;;  %v438_v52 = vld [vmem:[%s1114_s2 + $0x50] sm:$0xff] }
   0xd   :  { %67 = vperm.xlu2 %630, %v29_v5   ;;  %v849_v25 = vperm.slane %v846_v24, 0  ;;  %v852_v26 = vperm.slane %v846_v24, 1  ;;  %v442_v53 = vld [vmem:[%s1114_s2 + $0x70] sm:$0xff]  ;;  %v433_v60 = vld [vmem:[%s1114_s2 + $0x28] sm:$0xff] }
   0xe   :  { %166 = vperm.xlu0 %633, %v744_v6   ;;  %57 = vperm.xlu1 %629, %v749_v7   ;;  %v441_v61 = vld [vmem:[%s1114_s2 + $0x68] sm:$0xff] }
  0x15   :  { %82 = vperm.xlu2 %630, %v756_v8  }
  0x16   :  { %178 = vperm.xlu0 %633, %v761_v9   ;;  %77 = vperm.xlu1 %629, %v744_v6  }
  0x1d   :  { %97 = vperm.xlu2 %630, %v769_v10  }
  0x1e   :  { %190 = vperm.xlu0 %633, %v774_v11   ;;  %92 = vperm.xlu1 %629, %v761_v9  }
  0x25   :  { %112 = vperm.xlu2 %630, %v782_v12  }
  0x26   :  { %634 = vset.pattern.permute.xlu0 %v687_v14  ;;  %107 = vperm.xlu1 %629, %v774_v11  }
  0x27   :  { %235 = vperm.xlu0 %634, %v787_v13  }
  0x2d   :  { %632 = vset.pattern.permute.xlu2 %v685_v3 }
  0x2e   :  { %631 = vset.pattern.permute.xlu1 %v685_v3  ;;  %142 = vperm.xlu2 %632, %v796_v15  }
  0x2f   :  { %255 = vperm.xlu0 %634, %v29_v5   ;;  %138 = vperm.xlu1 %631, %v787_v13  }
  0x36   :  { %154 = vperm.xlu2 %632, %v726_v1  }
  0x37   :  { %267 = vperm.xlu0 %634, %v756_v8   ;;  %150 = vperm.xlu1 %631, %v749_v7  }
  0x3e   :  { %162 = vperm.xlu2 %632, %v806_v16  }
  0x3f   :  { %637 = vset.pattern.permute.xlu0 %v688_v18  ;;  %158 = vperm.xlu1 %631, %v29_v5  }
  0x40   :  { %392 = vperm.xlu0 %637, %v39_v17  }
  0x46   :  { %174 = vperm.xlu2 %632, %v816_v19  }
  0x47   :  { %170 = vperm.xlu1 %631, %v756_v8  }
  0x48   :  { %376 = vperm.xlu0 %637, %v769_v10  }
  0x4e   :  { %186 = vperm.xlu2 %632, %v36_v20  }
  0x4f   :  { %182 = vperm.xlu1 %631, %v769_v10  }
  0x50   :  { %368 = vperm.xlu0 %637, %v816_v19  }
  0x56   :  { %198 = vperm.xlu2 %632, %v39_v17  }
  0x57   :  { %194 = vperm.xlu1 %631, %v782_v12  }
  0x58   :  { %352 = vperm.xlu0 %637, %v29_v5   ;;  %v440_v5 = vld [vmem:[%s1114_s2 + $0x60] sm:$0xff] }
  0x5e   :  { %636 = vset.pattern.permute.xlu2 %v687_v14 }
  0x5f   :  { %635 = vset.pattern.permute.xlu1 %v687_v14  ;;  %v63_v21 = vpop.permute.xlu2 %62  ;;  %243 = vperm.xlu2 %636, %v731_v2  }
  0x60   :  { %647 = vset.pattern.permute.xlu0 %v686_v4  ;;  %239 = vperm.xlu1 %635, %v796_v15   ;;  %v125_v46 = vmul.f32 %v849_v25, %v63_v21 }
  0x61   :  { %42 = vperm.xlu0 %647, %v787_v13  }
  0x67   :  { %v833_v22 = vpop.permute.xlu2 %67  ;;  %251 = vperm.xlu2 %636, %v726_v1  }
  0x68   :  { %247 = vperm.xlu1 %635, %v749_v7  }
  0x69   :  { %47 = vperm.xlu0 %647, %v796_v15  }
  0x6f   :  { %v838_v23 = vpop.permute.xlu2 %82  ;;  %263 = vperm.xlu2 %636, %v744_v6  }
  0x70   :  { %259 = vperm.xlu1 %635, %v806_v16  }
  0x71   :  { %72 = vperm.xlu0 %647, %v806_v16  }
  0x77   :  { %v854_v27 = vpop.permute.xlu2 %97  ;;  %291 = vperm.xlu2 %636, %v782_v12  }
  0x78   :  { %v147_v28 = vpop.permute.xlu0 %146  ;;  %v53_v29 = vpop.permute.xlu1 %52  ;;  %295 = vperm.xlu1 %635, %v39_v17  }
  0x79   :  { %v204_v30 = vmul.f32 %v852_v26, %v147_v28  ;;  %v123_v31 = vmul.f32 %v849_v25, %v53_v29  ;;  %87 = vperm.xlu0 %647, %v816_v19   ;;  %v439_v28 = vld [vmem:[%s1114_s2 + $0x58] sm:$0xff]  ;;  %v126_v29 = vmul.f32 %v849_v25, %v833_v22  ;;  %v129_v22 = vmul.f32 %v849_v25, %v838_v23 }
  0x7b   :  { %v860_v32 = vadd.f32 %v204_v30, %v123_v31 }
  0x7f   :  { %v862_v33 = vpop.permute.xlu2 %112  ;;  %638 = vset.pattern.permute.xlu2 %v688_v18 }
  0x80   :  { %v58_v34 = vpop.permute.xlu1 %57  ;;  %287 = vperm.xlu1 %635, %v774_v11   ;;  %388 = vperm.xlu2 %638, %v782_v12   ;;  %v167_v35 = vpop.permute.xlu0 %166 }
  0x81   :  { %102 = vperm.xlu0 %647, %v36_v20   ;;  %v209_v36 = vmul.f32 %v852_v26, %v167_v35  ;;  %v124_v12 = vmul.f32 %v849_v25, %v58_v34 }
  0x88   :  { %v78_v37 = vpop.permute.xlu1 %77  ;;  %283 = vperm.xlu1 %635, %v36_v20   ;;  %384 = vperm.xlu2 %638, %v774_v11   ;;  %v869_v38 = vpop.permute.xlu2 %142 }
  0x89   :  { %v128_v39 = vmul.f32 %v849_v25, %v78_v37  ;;  %117 = vperm.xlu0 %647, %v39_v17   ;;  %v179_v40 = vpop.permute.xlu0 %178 }
  0x8a   :  { %v212_v43 = vmul.f32 %v852_v26, %v179_v40 }
  0x8b   :  { %v872_v41 = vadd.f32 %v209_v36, %v128_v39 }
  0x90   :  { %v93_v44 = vpop.permute.xlu1 %92  ;;  %279 = vperm.xlu1 %635, %v769_v10   ;;  %380 = vperm.xlu2 %638, %v36_v20   ;;  %v155_v45 = vpop.permute.xlu2 %154 }
  0x91   :  { %v131_v47 = vmul.f32 %v849_v25, %v93_v44  ;;  %v206_v48 = vmul.f32 %v852_v26, %v155_v45  ;;  %521 = vperm.xlu0 %647, %v443_v42   ;;  %v191_v49 = vpop.permute.xlu0 %190 }
  0x92   :  { %v215_v54 = vmul.f32 %v852_v26, %v191_v49 }
  0x93   :  { %v882_v50 = vadd.f32 %v212_v43, %v131_v47  ;;  %v884_v51 = vadd.f32 %v206_v48, %v125_v46  ;;  %v437_v43 = vld [vmem:[%s1114_s2 + $0x48] sm:$0xff]  ;;  %v132_v47 = vmul.f32 %v849_v25, %v854_v27  ;;  %v980_v27 = vperm.slane %v846_v24, 3 }
  0x98   :  { %v108_v55 = vpop.permute.xlu1 %107  ;;  %639 = vset.pattern.permute.xlu1 %v686_v4  ;;  %640 = vset.pattern.permute.xlu2 %v687_v14  ;;  %v895_v56 = vpop.permute.xlu2 %162 }
  0x99   :  { %v134_v57 = vmul.f32 %v849_v25, %v108_v55  ;;  %496 = vperm.xlu0 %647, %v438_v52   ;;  %516 = vperm.xlu1 %639, %v442_v53   ;;  %v898_v58 = vpop.permute.xlu0 %235  ;;  %v436_v52 = vld [vmem:[%s1114_s2 + $0x40] sm:$0xff] }
  0x9a   :  { %275 = vperm.xlu2 %640, %v761_v9  }
  0x9b   :  { %v901_v59 = vadd.f32 %v215_v54, %v134_v57 }
  0xa0   :  { %v909_v62 = vpop.permute.xlu2 %174 }
  0xa1   :  { %471 = vperm.xlu0 %647, %v433_v60   ;;  %511 = vperm.xlu1 %639, %v441_v61   ;;  %v911_v63 = vpop.permute.xlu1 %138  ;;  %v256_v0 = vpop.permute.xlu0 %255 }
  0xa2   :  { %271 = vperm.xlu2 %640, %v816_v19   ;;  %v929_v19 = vperm.slane %v846_v24, 2 }
  0xa8   :  { %v914_v3 = vpop.permute.xlu2 %186 }
  0xa9   :  { %652 = vset.pattern.permute.xlu0 %v688_v18  ;;  %641 = vset.pattern.permute.xlu1 %v688_v18  ;;  %v151_v10 = vpop.permute.xlu1 %150  ;;  %v268_v11 = vpop.permute.xlu0 %267 }
  0xaa   :  { %v205_v14 = vmul.f32 %v852_v26, %v151_v10  ;;  %642 = vset.pattern.permute.xlu2 %v686_v4  ;;  %332 = vperm.xlu0 %652, %v787_v13   ;;  %v304_v13 = vmul.f32 %v929_v19, %v256_v0  ;;  %v307_v37 = vmul.f32 %v929_v19, %v268_v11  ;;  %v435_v0 = vld [vmem:[%s1114_s2 + $0x38] sm:$0xff]  ;;  %v434_v11 = vld [vmem:[%s1114_s2 + $0x30] sm:$0xff] }
  0xab   :  { %372 = vperm.xlu1 %641, %v761_v9   ;;  %506 = vperm.xlu2 %642, %v440_v5  }
  0xac   :  { %v926_v17 = vadd.f32 %v205_v14, %v124_v12  ;;  %v202_v12 = vmul.f32 %v852_v26, %v911_v63  ;;  %v432_v63 = vld [vmem:[%s1114_s2 + $0x20] sm:$0xff] }
  0xb0   :  { %v931_v20 = vpop.permute.xlu2 %198 }
  0xb1   :  { %v159_v21 = vpop.permute.xlu1 %158 }
  0xb2   :  { %v207_v9 = vmul.f32 %v852_v26, %v159_v21  ;;  %v940_v30 = vpop.permute.xlu0 %392  ;;  %654 = vset.pattern.permute.xlu0 %v686_v4 }
  0xb3   :  { %643 = vset.pattern.permute.xlu1 %v686_v4  ;;  %644 = vset.pattern.permute.xlu2 %v688_v18 }
  0xb4   :  { %v223_v31 = vadd.f32 %v207_v9, %v126_v29  ;;  %501 = vperm.xlu1 %643, %v439_v28   ;;  %364 = vperm.xlu2 %644, %v756_v8  }
  0xb6   :  { %v320_v34 = vadd.f32 %v304_v13, %v223_v31 }
  0xb9   :  { %v171_v35 = vpop.permute.xlu1 %170  ;;  %v244_v36 = vpop.permute.xlu2 %243 }
  0xba   :  { %v210_v39 = vmul.f32 %v852_v26, %v171_v35  ;;  %v301_v40 = vmul.f32 %v929_v19, %v244_v36  ;;  %v951_v42 = vpop.permute.xlu0 %376 }
  0xbc   :  { %v226_v44 = vadd.f32 %v210_v39, %v129_v22  ;;  %v957_v8 = vadd.f32 %v301_v40, %v860_v32  ;;  %645 = vset.pattern.permute.xlu1 %v688_v18  ;;  %646 = vset.pattern.permute.xlu2 %v686_v4 }
  0xbd   :  { %360 = vperm.xlu1 %645, %v744_v6   ;;  %491 = vperm.xlu2 %646, %v437_v43  }
  0xbe   :  { %v962_v23 = vadd.f32 %v307_v37, %v226_v44 }
  0xc1   :  { %v183_v45 = vpop.permute.xlu1 %182  ;;  %v252_v46 = vpop.permute.xlu2 %251 }
  0xc2   :  { %v213_v48 = vmul.f32 %v852_v26, %v183_v45  ;;  %v303_v49 = vmul.f32 %v929_v19, %v252_v46  ;;  %v968_v32 = vpop.permute.xlu0 %368 }
  0xc4   :  { %v973_v53 = vadd.f32 %v213_v48, %v132_v47  ;;  %v976_v6 = vadd.f32 %v303_v49, %v884_v51  ;;  %v430_v47 = vld [vmem:[%s1114_s2 + $0x10] sm:$0xff] }
  0xc5   :  { %356 = vperm.xlu1 %645, %v806_v16   ;;  %486 = vperm.xlu2 %646, %v436_v52   ;;  %v557_v52 = vld [vmem:[#allocation2] sm:$0x1] }
  0xc9   :  { %v982_v54 = vpop.permute.xlu1 %194  ;;  %v264_v55 = vpop.permute.xlu2 %263 }
  0xca   :  { %v306_v57 = vmul.f32 %v929_v19, %v264_v55  ;;  %v353_v60 = vpop.permute.xlu0 %352  ;;  %v428_v55 = vld [vmem:[%s1114_s2] sm:$0xff] }
  0xcb   :  { %v401_v61 = vmul.f32 %v980_v27, %v353_v60 }
  0xcc   :  { %v990_v51 = vadd.f32 %v306_v57, %v872_v41  ;;  %v299_v41 = vmul.f32 %v929_v19, %v898_v58  ;;  %v203_v58 = vmul.f32 %v852_v26, %v869_v38 }
  0xcd   :  { %648 = vset.pattern.permute.xlu1 %v686_v4  ;;  %649 = vset.pattern.permute.xlu2 %v688_v18  ;;  %v994_v16 = vadd.f32 %v401_v61, %v320_v34  ;;  %v211_v61 = vmul.f32 %v852_v26, %v909_v62  ;;  %v411_v62 = vmul.f32 %v980_v27, %v940_v30 }
  0xce   :  { %481 = vperm.xlu1 %648, %v435_v0   ;;  %348 = vperm.xlu2 %649, %v726_v1   ;;  %v217_v0 = vmul.f32 %v852_v26, %v931_v20  ;;  %v216_v20 = vmul.f32 %v852_v26, %v982_v54  ;;  %v407_v30 = vmul.f32 %v980_v27, %v951_v42 }
  0xd1   :  { %v997_v24 = vpop.permute.xlu2 %291 }
  0xd2   :  { %v240_v5 = vpop.permute.xlu1 %239 }
  0xd3   :  { %v43_v10 = vpop.permute.xlu0 %42 }
  0xd4   :  { %v121_v14 = vmul.f32 %v849_v25, %v43_v10 }
  0xd6   :  { %v218_v21 = vadd.f32 %v202_v12, %v121_v14  ;;  %476 = vperm.xlu1 %648, %v434_v11   ;;  %344 = vperm.xlu2 %649, %v749_v7   ;;  %v300_v7 = vmul.f32 %v929_v19, %v240_v5 }
  0xd8   :  { %v1008_v1 = vadd.f32 %v299_v41, %v218_v21  ;;  %v405_v21 = vmul.f32 %v980_v27, %v968_v32  ;;  %v313_v32 = vmul.f32 %v929_v19, %v997_v24 }
  0xda   :  { %v248_v28 = vpop.permute.xlu1 %247  ;;  %v1010_v29 = vpop.permute.xlu2 %388 }
  0xdb   :  { %v302_v13 = vmul.f32 %v929_v19, %v248_v28  ;;  %v48_v9 = vpop.permute.xlu0 %47  ;;  %v410_v54 = vmul.f32 %v980_v27, %v1010_v29 }
  0xdc   :  { %v122_v31 = vmul.f32 %v849_v25, %v48_v9 }
  0xdd   :  { %v1020_v34 = vadd.f32 %v302_v13, %v926_v17  ;;  %v208_v17 = vmul.f32 %v852_v26, %v895_v56  ;;  %v429_v56 = vld [vmem:[%s1114_s2 + $0x8] sm:$0xff] }
  0xde   :  { %v219_v35 = vadd.f32 %v203_v58, %v122_v31  ;;  %650 = vset.pattern.permute.xlu1 %v688_v18  ;;  %651 = vset.pattern.permute.xlu2 %v686_v4  ;;  %v431_v18 = vld [vmem:[%s1114_s2 + $0x18] sm:$0xff] }
  0xdf   :  { %340 = vperm.xlu1 %650, %v731_v2   ;;  %466 = vperm.xlu2 %651, %v432_v63  }
  0xe0   :  { %v1026_v38 = vadd.f32 %v300_v7, %v219_v35  ;;  %v135_v35 = vmul.f32 %v849_v25, %v862_v33  ;;  %v214_v33 = vmul.f32 %v852_v26, %v914_v3 }
  0xe2   :  { %v260_v36 = vpop.permute.xlu1 %259  ;;  %v1028_v22 = vpop.permute.xlu2 %384 }
  0xe3   :  { %v73_v37 = vpop.permute.xlu0 %72  ;;  %v305_v40 = vmul.f32 %v929_v19, %v260_v36  ;;  %v409_v29 = vmul.f32 %v980_v27, %v1028_v22 }
  0xe4   :  { %v127_v39 = vmul.f32 %v849_v25, %v73_v37 }
  0xe6   :  { %v224_v43 = vadd.f32 %v208_v17, %v127_v39  ;;  %v232_v39 = vadd.f32 %v216_v20, %v135_v35 }
  0xe7   :  { %336 = vperm.xlu1 %650, %v796_v15   ;;  %461 = vperm.xlu2 %651, %v431_v18  }
  0xe8   :  { %v1038_v2 = vadd.f32 %v305_v40, %v224_v43  ;;  %v329_v43 = vadd.f32 %v313_v32, %v232_v39 }
  0xea   :  { %v296_v44 = vpop.permute.xlu1 %295  ;;  %v381_v45 = vpop.permute.xlu2 %380 }
  0xeb   :  { %v88_v46 = vpop.permute.xlu0 %87  ;;  %v314_v12 = vmul.f32 %v929_v19, %v296_v44 }
  0xec   :  { %v130_v57 = vmul.f32 %v849_v25, %v88_v46  ;;  %v426_v46 = vadd.f32 %v410_v54, %v329_v43 }
  0xee   :  { %v227_v11 = vadd.f32 %v211_v61, %v130_v57 }
  0xef   :  { %653 = vset.pattern.permute.xlu1 %v686_v4  ;;  %451 = vperm.xlu2 %651, %v429_v56  }
  0xf0   :  { %456 = vperm.xlu1 %653, %v430_v47  }
  0xf2   :  { %v288_v48 = vpop.permute.xlu1 %287 }
  0xf3   :  { %v103_v15 = vpop.permute.xlu0 %102  ;;  %v312_v24 = vmul.f32 %v929_v19, %v288_v48 }
  0xf4   :  { %v1047_v49 = vpop.permute.xlu2 %275  ;;  %v133_v44 = vmul.f32 %v849_v25, %v103_v15  ;;  %v408_v15 = vmul.f32 %v980_v27, %v381_v45 }
  0xf5   :  { %v309_v22 = vmul.f32 %v929_v19, %v1047_v49 }
  0xf6   :  { %v230_v56 = vadd.f32 %v214_v33, %v133_v44 }
  0xf7   :  { %560 = vperm.xlu2 %651, %v557_v52   ;;  %v328_v52 = vadd.f32 %v312_v24, %v901_v59 }
  0xf8   :  { %446 = vperm.xlu1 %653, %v428_v55  }
  0xf9   :  { %v425_v3 = vadd.f32 %v409_v29, %v328_v52 }
  0xfa   :  { %v284_v60 = vpop.permute.xlu1 %283 }
  0xfb   :  { %v118_v4 = vpop.permute.xlu0 %117  ;;  %v311_v42 = vmul.f32 %v929_v19, %v284_v60 }
  0xfc   :  { %v136_v5 = vmul.f32 %v849_v25, %v118_v4  ;;  %v272_v10 = vpop.permute.xlu2 %271 }
  0xfd   :  { %v308_v41 = vmul.f32 %v929_v19, %v272_v10  ;;  %v327_v55 = vadd.f32 %v311_v42, %v230_v56 }
  0xfe   :  { %v233_v14 = vadd.f32 %v217_v0, %v136_v5 }
  0xff   :  { %v324_v28 = vadd.f32 %v308_v41, %v227_v11  ;;  %v424_v26 = vadd.f32 %v408_v15, %v327_v55  ;;  %v325_v11 = vadd.f32 %v309_v22, %v882_v50 }
 0x100   :  { %v330_v13 = vadd.f32 %v314_v12, %v233_v14 }
 0x101   :  { %v421_v9 = vadd.f32 %v405_v21, %v324_v28 }
 0x102   :  { %v280_v58 = vpop.permute.xlu1 %279  ;;  %v427_v31 = vadd.f32 %v411_v62, %v330_v13 }
 0x103   :  { %v310_v63 = vmul.f32 %v929_v19, %v280_v58  ;;  %v522_v7 = vpop.permute.xlu0 %521 }
 0x104   :  { %v539_v36 = vadd.f32 %v522_v7, %v427_v31 }
 0x105   :  { %v326_v37 = vadd.f32 %v310_v63, %v973_v53  ;;  %v507_v17 = vpop.permute.xlu2 %506 }
 0x106   :  { %v555_v18 = vmax.f32 %v539_v36, 0.0  ;;  %v536_v61 = vadd.f32 %v507_v17, %v424_v26 }
 0x107   :  { %v423_v40 = vadd.f32 %v407_v30, %v326_v37 }
 0x108   :  { %564 = vmatpush.msra.mxu0 %v555_v18  ;;  %v552_v0 = vmax.f32 %v536_v61, 0.0 }
 0x10b   :  { %v517_v53 = vpop.permute.xlu1 %516  ;;  %v497_v14 = vpop.permute.xlu0 %496 }
 0x10c   :  { %v538_v47 = vadd.f32 %v517_v53, %v426_v46 }
 0x10e   :  { %v554_v57 = vmax.f32 %v538_v47, 0.0  ;;  %v365_v25 = vpop.permute.xlu2 %364 }
 0x10f   :  { %v404_v12 = vmul.f32 %v980_v27, %v365_v25 }
 0x110   :  { %565 = vmatpush.msra.mxu0 %v554_v57 }
 0x111   :  { %v420_v20 = vadd.f32 %v404_v12, %v962_v23 }
 0x113   :  { %v512_v48 = vpop.permute.xlu1 %511  ;;  %v472_v18 = vpop.permute.xlu0 %471 }
 0x114   :  { %v537_v60 = vadd.f32 %v512_v48, %v425_v3  ;;  %v529_v33 = vadd.f32 %v472_v18, %v994_v16 }
 0x116   :  { %v553_v4 = vmax.f32 %v537_v60, 0.0  ;;  %v545_v47 = vmax.f32 %v529_v33, 0.0 }
 0x117   :  { %v492_v5 = vpop.permute.xlu2 %491 }
 0x118   :  { %566 = vmatpush.msra.mxu0 %v553_v4  ;;  %v533_v13 = vadd.f32 %v492_v5, %v421_v9 }
 0x11a   :  { %567 = vmatpush.msra.mxu0 %v552_v0  ;;  %v549_v63 = vmax.f32 %v533_v13, 0.0 }
 0x11c   :  { %v333_v15 = vpop.permute.xlu0 %332 }
 0x11d   :  { %v373_v59 = vpop.permute.xlu1 %372  ;;  %v396_v60 = vmul.f32 %v980_v27, %v333_v15 }
 0x11e   :  { %v406_v10 = vmul.f32 %v980_v27, %v373_v59 }
 0x11f   :  { %v487_v45 = vpop.permute.xlu2 %486  ;;  %v412_v5 = vadd.f32 %v396_v60, %v1008_v1 }
 0x120   :  { %v422_v41 = vadd.f32 %v406_v10, %v325_v11  ;;  %v532_v31 = vadd.f32 %v487_v45, %v420_v20 }
 0x122   :  { %v534_v62 = vadd.f32 %v497_v14, %v422_v41  ;;  %v548_v7 = vmax.f32 %v532_v31, 0.0 }
 0x124   :  { %v550_v19 = vmax.f32 %v534_v62, 0.0 }
 0x126   :  { %v502_v21 = vpop.permute.xlu1 %501 }
 0x127   :  { %v535_v28 = vadd.f32 %v502_v21, %v423_v40 }
 0x128   :  { %v349_v49 = vpop.permute.xlu2 %348 }
 0x129   :  { %v551_v58 = vmax.f32 %v535_v28, 0.0  ;;  %v400_v54 = vmul.f32 %v980_v27, %v349_v49 }
 0x12b   :  { %568 = vmatpush.msra.mxu0 %v551_v58  ;;  %v416_v24 = vadd.f32 %v400_v54, %v976_v6 }
 0x12d   :  { %569 = vmatpush.msra.mxu0 %v550_v19 }
 0x12f   :  { %v361_v50 = vpop.permute.xlu1 %360  ;;  %570 = vmatpush.msra.mxu0 %v549_v63 }
 0x130   :  { %v345_v35 = vpop.permute.xlu2 %344  ;;  %v403_v36 = vmul.f32 %v980_v27, %v361_v50 }
 0x131   :  { %571 = vmatpush.msra.mxu0 %v548_v7  ;;  %v399_v40 = vmul.f32 %v980_v27, %v345_v35 }
 0x132   :  { %v419_v30 = vadd.f32 %v403_v36, %v990_v51 }
 0x133   :  { %v415_v53 = vadd.f32 %v399_v40, %v1020_v34 }
 0x137   :  { %v357_v32 = vpop.permute.xlu1 %356 }
 0x138   :  { %v402_v17 = vmul.f32 %v980_v27, %v357_v32 }
 0x139   :  { %v467_v9 = vpop.permute.xlu2 %466 }
 0x13a   :  { %v418_v43 = vadd.f32 %v402_v17, %v1038_v2  ;;  %v528_v46 = vadd.f32 %v467_v9, %v416_v24 }
 0x13c   :  { %v544_v52 = vmax.f32 %v528_v46, 0.0 }
 0x140   :  { %v482_v37 = vpop.permute.xlu1 %481 }
 0x141   :  { %v531_v23 = vadd.f32 %v482_v37, %v419_v30  ;;  %v462_v42 = vpop.permute.xlu2 %461 }
 0x142   :  { %v527_v29 = vadd.f32 %v462_v42, %v415_v53 }
 0x143   :  { %v547_v39 = vmax.f32 %v531_v23, 0.0 }
 0x144   :  { %v543_v55 = vmax.f32 %v527_v29, 0.0 }
 0x145   :  { %572 = vmatpush.msra.mxu0 %v547_v39 }
 0x148   :  { %v477_v44 = vpop.permute.xlu1 %476 }
 0x149   :  { %v530_v51 = vadd.f32 %v477_v44, %v418_v43  ;;  %v452_v26 = vpop.permute.xlu2 %451 }
 0x14b   :  { %v546_v56 = vmax.f32 %v530_v51, 0.0 }
 0x14d   :  { %573 = vmatpush.msra.mxu0 %v546_v56 }
 0x14f   :  { %574 = vmatpush.msra.mxu0 %v545_v47 }
 0x151   :  { %v341_v57 = vpop.permute.xlu1 %340  ;;  %575 = vmatpush.msra.mxu0 %v544_v52 }
 0x152   :  { %v398_v6 = vmul.f32 %v980_v27, %v341_v57 }
 0x153   :  { %576 = vmatpush.msra.mxu0 %v543_v55 }
 0x154   :  { %v414_v34 = vadd.f32 %v398_v6, %v957_v8  ;;  %v561_v8 = vpop.permute.xlu2 %560 }
 0x155   :  { %v563_v11 = vperm.slane %v561_v8, 0 }
 0x159   :  { %v337_v2 = vpop.permute.xlu1 %336 }
 0x15a   :  { %v397_v16 = vmul.f32 %v980_v27, %v337_v2 }
 0x15c   :  { %v413_v25 = vadd.f32 %v397_v16, %v1026_v38  ;;  %v556_v38 = vld [vmem:[%s1115_s3] sm:$0x1]  ;;  %s689_s3 = smov [#allocation3]  }
 0x15d   :  { %s613_s30 = sshll.u32 %s689_s3, 4  ;;  %s614_s30 = int_to_ptr.vmem [resolvable:$true] %s613_s30 }
 0x15e   :  { %v525_v61 = vadd.f32 %v452_v26, %v413_v25 }
 0x160   :  { %v541_v0 = vmax.f32 %v525_v61, 0.0 }
 0x162   :  { %v457_v3 = vpop.permute.xlu1 %456 }
 0x163   :  { %v526_v48 = vadd.f32 %v457_v3, %v414_v34 }
 0x165   :  { %v542_v4 = vmax.f32 %v526_v48, 0.0 }
 0x167   :  { %577 = vmatpush.msra.mxu0 %v542_v4 }
 0x169   :  { %578 = vmatpush.msra.mxu0 %v541_v0 }
 0x16a   :  { %v447_v22 = vpop.permute.xlu1 %446 }
 0x16b   :  { %v524_v59 = vadd.f32 %v447_v22, %v412_v5 }
 0x16d   :  { %v540_v10 = vmax.f32 %v524_v59, 0.0 }
 0x16f   :  { %579 = vmatpush.msra.mxu0 %v540_v10 }
 0x170   :  { %580 = vmatmul.f32.vlgmr.msra.gmra.mxu0 %v556_v38 }
 0x1ed   :  { %v581_v45 = vpop.f32.mrf.mxu0 }
 0x1ee   :  { %v582_v41 = vadd.f32 %v581_v45, %v563_v11 }
 0x1f0   :  { %v584_v27 = vmul.f32 1.442695, %v582_v41 }
 0x1f2   :  { %655 = vpow2.f32 %v584_v27 }
 0x1f8   :  { %v656_v12 = vpop.eup %655 }
 0x1f9   :  { %v586_v14 = vadd.f32 1.0, %v656_v12 }
 0x1fb   :  { %657 = vrcp.f32 %v586_v14  ;;  %v598_v62 = vand.u32 2147483648, %v586_v14  ;;  %v596_v20 = vand.u32 2147483647, %v586_v14  ;;  %vm592_vm1 = vweird.f32 %v586_v14 }
 0x1fd   :  { %v599_v31 = vor.u32 1.1754944e-38, %v598_v62  ;;  %vm597_vm3 = vcmp.eq.f32.partialorder %v596_v20, 8.507059e+37 }
 0x201   :  { %v658_v21 = vpop.eup %657 }
 0x202   :  { %v588_v1 = vmul.f32 %v658_v21, %v586_v14  ;;  %vm593_vm0 = vweird.f32 %v658_v21 }
 0x203   :  { %vm594_vm2 = vmor %vm592_vm1, %vm593_vm0 }
 0x204   :  { %v589_v28 = vsub.f32 1.0, %v588_v1 }
 0x206   :  { %v590_v13 = vmul.f32 %v658_v21, %v589_v28 }
 0x208   :  { %v591_v58 = vadd.f32 %v658_v21, %v590_v13 }
 0x20a   :  { %v595_v19 = vsel %vm594_vm2, %v658_v21, %v591_v58 }
 0x20b   :  { %v600_v49 = vsel %vm597_vm3, %v599_v31, %v595_v19 }
 0x20c   :  { %v601_v63 = vsub.f32 1.0, %v600_v49  ;;  %v603_v7 = vrot.slane %v600_v49, 7 }
 0x20e   :  { %v606_v50 = vsel %vm605_vm4, %v601_v63, %v603_v7 }
 0x20f   :  { %607 = vst [vmem:[#allocation3] sm:$0x3] %v606_v50 }
 0x210   :  { %618 = dma.vmem_to_hbm [thread:$0]  %s614_s30, 32, %s616_s8, [#allocation4]  }
 0x211   :  { %683 = dma.done.wait [#allocation4], 32  }
 0x212   :  { %684 = vsyncadd [#allocation4], 4294967264 }
 0x213   :  { %623 = vsyncpa [#allocation4], 1 }

</bundles_post_ra>
